<compile_context>
chip_gen: v6e
topology: v6e:2x2x1
jax: 0.10.0
libtpu: 0.0.40
codegen_flags: <defaults>
</compile_context>

<pallas_src>
import functools

import jax
import jax.numpy as jnp
from jax.experimental import pallas as pl
from jax.experimental.pallas import tpu as pltpu


def _linear3d_kernel(sum_ref, x_ref, w_ref, b_ref, o_ref, *, apply_sum):
    # sum_ref: SMEM scalar-prefetch (1,) f32 (value of sum_from, 0.0 if unused)
    # x_ref : (K, 1)   resident across tiles (constant index_map)
    # w_ref : (K, TN)  pre-transposed, lane-dense weight tile
    # b_ref : (1, TN)
    # o_ref : (1, TN)
    w = w_ref[...].astype(jnp.float32)
    x = x_ref[...].astype(jnp.float32)          # (K, 1) -> lane-broadcast over TN
    y = jnp.sum(w * x, axis=0, keepdims=True)   # VPU mul + XLU sublane-reduce -> (1, TN)
    y = y + b_ref[...].astype(jnp.float32)
    if apply_sum:
        # torch.ones_like(x) * sum_from + torch.sigmoid(x)
        y = sum_ref[0] + jax.nn.sigmoid(y)
    o_ref[...] = y.astype(o_ref.dtype)


def _round_up(v, m):
    return ((v + m - 1) // m) * m


def _pick_tile_n(n_pad, in_features):
    """Largest 128-multiple divisor of n_pad whose double-buffered *physical*
    weight tile (sublane-padded K) stays under a 12 MiB budget (safe below
    v5e's 16 MiB scoped-VMEM default, trivially safe on v6e/v7x)."""
    k_phys = max(8, _round_up(in_features, 8))      # f32 sublane tiling
    budget_bytes = 12 * 1024 * 1024                 # for 2x weight buffers
    cap = max(128, (budget_bytes // (2 * k_phys * 4) // 128) * 128)

    m = n_pad // 128
    tn = 128
    for d in range(m, 0, -1):
        if m % d == 0 and 128 * d <= cap:
            tn = 128 * d
            break

    # v7x has 2 TensorCores: give "parallel" something to split only when the
    # weight stream (not the ~0.35us/step overhead) dominates.
    single_tile_bytes = n_pad * k_phys * 4
    if tn == n_pad and m % 2 == 0 and single_tile_bytes > (4 << 20):
        tn = n_pad // 2
    return tn


def prepare_linear3d_params(weight, bias):
    """One-time parameter-load transform: PyTorch (out_f, in_f) weight ->
    lane-dense (in_f, n_pad) + padded (1, n_pad) bias.  Done once, not per call."""
    out_features, in_features = weight.shape
    assert bias.shape == (out_features,)
    n_pad = _round_up(out_features, 128)
    w_t = jnp.asarray(weight).T                      # (K, N)
    b = jnp.asarray(bias)
    if n_pad != out_features:
        w_t = jnp.pad(w_t, ((0, 0), (0, n_pad - out_features)))
        b = jnp.pad(b, (0, n_pad - out_features))
    return w_t, b.reshape(1, n_pad)


def linear3d_forward(x, w_t, b_2d, out_shape, sum_from=None):
    """x: (in_features,); w_t: (in_features, n_pad) from prepare_linear3d_params;
    b_2d: (1, n_pad); returns array of shape out_shape."""
    in_features = x.shape[0]
    n_pad = w_t.shape[1]
    out_features = out_shape[0] * out_shape[1]
    assert w_t.shape == (in_features, n_pad)
    assert b_2d.shape == (1, n_pad)
    assert n_pad >= out_features

    x_col = x.reshape(in_features, 1)

    tn = _pick_tile_n(n_pad, in_features)
    grid = (n_pad // tn,)

    apply_sum = sum_from is not None
    # Runtime scalar in f32 (no truncation if a float is ever passed).
    sum_arr = jnp.array([float(sum_from) if apply_sum else 0.0], dtype=jnp.float32)

    kernel = functools.partial(_linear3d_kernel, apply_sum=apply_sum)

    k_phys = max(8, _round_up(in_features, 8))
    w_stream_bytes = 2 * k_phys * tn * 4             # double-buffered weight tile
    # Never below the per-chip scoped defaults; cap under v7x's 64 MiB physical.
    vmem_limit = int(min(60 << 20, max(32 << 20, w_stream_bytes + (4 << 20))))

    cost = pl.CostEstimate(
        flops=2 * in_features * n_pad,
        transcendentals=n_pad if apply_sum else 0,
        bytes_accessed=4 * (in_features                  # x, DMA'd once (constant map)
                            + in_features * n_pad        # weight stream
                            + 2 * n_pad),                # bias + output
    )

    y = pl.pallas_call(
        kernel,
        out_shape=jax.ShapeDtypeStruct((1, n_pad), x.dtype),
        grid_spec=pltpu.PrefetchScalarGridSpec(
            num_scalar_prefetch=1,
            grid=grid,
            in_specs=[
                # x: full column, same block every tile (stays resident)
                pl.BlockSpec((in_features, 1), lambda j, s: (0, 0)),
                # weight: lane-dense (K, tn) slice per tile, default Buffered(2)
                pl.BlockSpec((in_features, tn), lambda j, s: (0, j)),
                # bias: matching lane-dense slice
                pl.BlockSpec((1, tn), lambda j, s: (0, j)),
            ],
            out_specs=pl.BlockSpec((1, tn), lambda j, s: (0, j)),
        ),
        compiler_params=pltpu.CompilerParams(
            dimension_semantics=("parallel",),    # lets v7x's 2 TCs split tiles
            vmem_limit_bytes=vmem_limit),
        cost_estimate=cost,
    )(sum_arr, x_col, w_t, b_2d)

    return y[0, :out_features].reshape(out_shape)


def _init_linear_params(key, in_features, out_features):
    # Deterministic init mimicking nn.Linear default: U(-1/sqrt(in), 1/sqrt(in))
    kw, kb = jax.random.split(key)
    bound = 1.0 / (in_features ** 0.5)
    weight = jax.random.uniform(
        kw, (out_features, in_features), jnp.float32, -bound, bound)
    bias = jax.random.uniform(kb, (out_features,), jnp.float32, -bound, bound)
    return weight, bias


if __name__ == "__main__":
    key = jax.random.PRNGKey(0)

    # --- case 1: out_features already lane-dense (8*16 = 128), sum_from path ---
    in_features = 32
    out_shape = (8, 16)
    out_features = out_shape[0] * out_shape[1]
    sum_from = 3

    kx, kp, kp2 = jax.random.split(key, 3)
    x = jax.random.normal(kx, (in_features,), jnp.float32)
    weight, bias = _init_linear_params(kp, in_features, out_features)

    # One-time parameter preparation (transpose + pad), NOT per forward call.
    w_t, b_2d = prepare_linear3d_params(weight, bias)

    out_sum = jax.block_until_ready(
        linear3d_forward(x, w_t, b_2d, out_shape, sum_from=sum_from))
    out_plain = jax.block_until_ready(
        linear3d_forward(x, w_t, b_2d, out_shape, sum_from=None))

    ref_lin = x @ weight.T + bias
    ref_plain = ref_lin.reshape(out_shape)
    ref_sum = (sum_from + jax.nn.sigmoid(ref_lin)).reshape(out_shape)

    assert out_sum.shape == out_shape and out_plain.shape == out_shape
    assert jnp.allclose(out_plain, ref_plain, atol=1e-5, rtol=1e-5)
    assert jnp.allclose(out_sum, ref_sum, atol=1e-5, rtol=1e-5)

    # --- case 2: non-lane-dense out_features (7*9 = 63) exercises N padding ---
    out_shape2 = (7, 9)
    out_features2 = out_shape2[0] * out_shape2[1]
    weight2, bias2 = _init_linear_params(kp2, in_features, out_features2)
    w_t2, b_2d2 = prepare_linear3d_params(weight2, bias2)

    out2 = jax.block_until_ready(
        linear3d_forward(x, w_t2, b_2d2, out_shape2, sum_from=sum_from))
    ref2 = (sum_from + jax.nn.sigmoid(x @ weight2.T + bias2)).reshape(out_shape2)
    assert out2.shape == out_shape2
    assert jnp.allclose(out2, ref2, atol=1e-5, rtol=1e-5)

    print("KERNEL_OK")
</pallas_src>

<mosaic_0001>
module attributes {stable_mosaic.version = 11 : i64} {
  func.func @_linear3d_kernel(%arg0: i32, %arg1: memref<1xf32, #tpu.memory_space<smem>>, %arg2: memref<32x1xf32, #tpu.memory_space<vmem>>, %arg3: memref<32x128xf32, #tpu.memory_space<vmem>>, %arg4: memref<1x128xf32, #tpu.memory_space<vmem>>, %arg5: memref<1x128xf32, #tpu.memory_space<vmem>>) attributes {dimension_semantics = [#tpu.dimension_semantics<parallel>], iteration_bounds = array<i64: 1>, scalar_prefetch = 1 : i64, scratch_operands = 0 : i64, tpu.core_type = #tpu.core_type<tc>, window_params = [{pipeline_mode = #tpu.pipeline_mode<synchronous>, transform_indices = @transform_0, window_bounds = array<i64: 32, 1>}, {transform_indices = @transform_1, window_bounds = array<i64: 32, 128>}, {transform_indices = @transform_2, window_bounds = array<i64: 1, 128>}, {transform_indices = @transform_3, window_bounds = array<i64: 1, 128>}]} {
    %c0 = arith.constant 0 : index
    %c0_0 = arith.constant 0 : index
    %0 = vector.load %arg3[%c0, %c0_0] : memref<32x128xf32, #tpu.memory_space<vmem>>, vector<32x128xf32>
    %c0_1 = arith.constant 0 : index
    %c0_2 = arith.constant 0 : index
    %1 = vector.load %arg2[%c0_1, %c0_2] : memref<32x1xf32, #tpu.memory_space<vmem>>, vector<32x1xf32>
    %2 = vector.broadcast %1 : vector<32x1xf32> to vector<32x128xf32>
    %3 = arith.mulf %0, %2 : vector<32x128xf32>
    %cst = arith.constant dense<0.000000e+00> : vector<128xf32>
    %4 = vector.multi_reduction <add>, %3, %cst [0] : vector<32x128xf32> to vector<128xf32>
    %5 = vector.shape_cast %4 : vector<128xf32> to vector<1x128xf32>
    %c0_3 = arith.constant 0 : index
    %c0_4 = arith.constant 0 : index
    %6 = vector.load %arg4[%c0_3, %c0_4] : memref<1x128xf32, #tpu.memory_space<vmem>>, vector<1x128xf32>
    %7 = arith.addf %5, %6 : vector<1x128xf32>
    %c0_5 = arith.constant 0 : index
    %8 = memref.load %arg1[%c0_5] : memref<1xf32, #tpu.memory_space<smem>>
    %9 = arith.negf %7 : vector<1x128xf32>
    %10 = math.exp %9 : vector<1x128xf32>
    %cst_6 = arith.constant 1.000000e+00 : f32
    %11 = vector.broadcast %cst_6 : f32 to vector<1x128xf32>
    %12 = arith.addf %11, %10 : vector<1x128xf32>
    %13 = arith.divf %11, %12 : vector<1x128xf32>
    %14 = vector.broadcast %8 : f32 to vector<1x128xf32>
    %15 = arith.addf %14, %13 : vector<1x128xf32>
    %c0_7 = arith.constant 0 : index
    %c0_8 = arith.constant 0 : index
    %16 = vector.load %arg5[%c0_7, %c0_8] : memref<1x128xf32, #tpu.memory_space<vmem>>, vector<1x128xf32>
    tpu.vector_store %arg5[%c0_7, %c0_8], %15 {strides = array<i32>} : memref<1x128xf32, #tpu.memory_space<vmem>>, vector<1x128xf32>,
    return
  }
  func.func @transform_0(%arg0: i32, %arg1: memref<1xf32, #tpu.memory_space<smem>>) -> (i32, i32) {
    %c0_i32 = arith.constant 0 : i32
    %c0_i32_0 = arith.constant 0 : i32
    %c0_i32_1 = arith.constant 0 : i32
    return %c0_i32, %c0_i32_0 : i32, i32
  }
  func.func @transform_1(%arg0: i32, %arg1: memref<1xf32, #tpu.memory_space<smem>>) -> (i32, i32) {
    %c0_i32 = arith.constant 0 : i32
    %c0_i32_0 = arith.constant 0 : i32
    return %c0_i32, %arg0 : i32, i32
  }
  func.func @transform_2(%arg0: i32, %arg1: memref<1xf32, #tpu.memory_space<smem>>) -> (i32, i32) {
    %c0_i32 = arith.constant 0 : i32
    %c0_i32_0 = arith.constant 0 : i32
    return %c0_i32, %arg0 : i32, i32
  }
  func.func @transform_3(%arg0: i32, %arg1: memref<1xf32, #tpu.memory_space<smem>>) -> (i32, i32) {
    %c0_i32 = arith.constant 0 : i32
    %c0_i32_0 = arith.constant 0 : i32
    return %c0_i32, %arg0 : i32, i32
  }
}

</mosaic_0001>

<bundles_post_ra>
// kernel: tpu_custom_call.1
= control target key start
LH: loop header
LB: loop body
LE: loop exit
PB: predicated region body
PF: predicated region fallthrough
CT: control target
= control target key end

     0   :  { %v115_v2 = vmov 0   ;;  %s175_s0 = inlined_call_operand.<no memory space> [shape: f32[1], index: 0, kind: input, shape index: {}]   ;;  %s176_s1 = inlined_call_operand.vmem [shape: f32[32,1], index: 1, kind: input, shape index: {}]   ;;  %s177_s2 = inlined_call_operand.vmem [shape: f32[32,128], index: 2, kind: input, shape index: {}]   ;;  %s178_s3 = inlined_call_operand.vmem [shape: f32[1,128], index: 3, kind: input, shape index: {}]   ;;  %s179_s4 = inlined_call_operand.hbm [shape: f32[1,128], index: 4, kind: output, shape index: {}]  }
   0x1   :  { %v23_v0 = vld [vmem:[%s176_s1 + $0x10] sm:$0xff]  ;;  %v21_v1 = vld [vmem:[%s176_s1] sm:$0xff]  ;;  %88 = vset.pattern.permute.xlu1 %v115_v2  ;;  %87 = vset.pattern.permute.xlu0 %v115_v2  ;;  %v24_v3 = vld [vmem:[%s176_s1 + $0x18] sm:$0xff] }
   0x2   :  { %37 = vperm.xlu1 %88, %v23_v0   ;;  %27 = vperm.xlu0 %87, %v21_v1   ;;  %v22_v4 = vld [vmem:[%s176_s1 + $0x8] sm:$0xff] }
   0x3   :  { %10 = vsyncpa [#allocation5], 0  ;;  %v17_v7 = vld [vmem:[%s177_s2] sm:$0xff]  ;;  %v18_v8 = vld [vmem:[%s177_s2 + $0x8] sm:$0xff]  ;;  %v67_v31 = vstv %s175_s0  ;;  %s116_s7 = smov [#allocation4]  }
   0x4   :  { %v19_v9 = vld [vmem:[%s177_s2 + $0x10] sm:$0xff]  ;;  %v20_v14 = vld [vmem:[%s177_s2 + $0x18] sm:$0xff]  ;;  %v58_v25 = vld [vmem:[%s178_s3] sm:$0x1]  ;;  %s76_s8 = sshll.u32 %s116_s7, 4  ;;  %s77_s8 = int_to_ptr.vmem [resolvable:$true] %s76_s8 }
   0x5   :  { %s93_s9 = scalar_lea.vmem %s77_s8, 16  ;;  %s97_s3 = scalar_lea.vmem %s77_s8, 32 }
   0x6   :  { %42 = vperm.xlu1 %88, %v24_v3   ;;  %32 = vperm.xlu0 %87, %v22_v4   ;;  %p94_p0 = scmp.ne.s32.totalorder %s77_s8, %s93_s9  ;;  %p98_p1 = scmp.lt.s32.totalorder %s77_s8, %s77_s8 }
   0x7   :  { %p99_p2 = scmp.lt.s32.totalorder %s97_s3, %s93_s9 }
   0x9   :  { %p100_p3 = por %p99_p2, %p98_p1 }
   0xb   :  { %p101_p4 = pnand %p100_p3, %p94_p0 }
  0x7d   :  { %v38_v5 = vpop.permute.xlu1 %37  ;;  %v28_v6 = vpop.permute.xlu0 %27 }
  0x7e   :  { %v45_v11 = vmul.f32 %v28_v6, %v17_v7  ;;  %v47_v15 = vmul.f32 %v38_v5, %v19_v9 }
  0x81   :  { %v33_v10 = vpop.permute.xlu0 %32  ;;  %v43_v13 = vpop.permute.xlu1 %42 }
  0x82   :  { %v46_v12 = vmul.f32 %v33_v10, %v18_v8  ;;  %v48_v17 = vmul.f32 %v43_v13, %v20_v14 }
  0x84   :  { %v49_v16 = vadd.f32 %v46_v12, %v45_v11 }
  0x86   :  { %v50_v18 = vadd.f32 %v49_v16, %v47_v15 }
  0x88   :  { %v51_v19 = vadd.f32 %v50_v18, %v48_v17 }
  0x8a   :  { %v52_v20 = vrot.slane %v51_v19, 4 }
  0x8c   :  { %v53_v21 = vadd.f32 %v52_v20, %v51_v19 }
  0x8e   :  { %v54_v22 = vrot.slane %v53_v21, 2 }
  0x90   :  { %v55_v23 = vadd.f32 %v54_v22, %v53_v21 }
  0x92   :  { %v56_v24 = vrot.slane %v55_v23, 1 }
  0x94   :  { %v57_v26 = vadd.f32 %v56_v24, %v55_v23 }
  0x96   :  { %v59_v27 = vadd.f32 %v58_v25, %v57_v26 }
  0x98   :  { %v84_v28 = vmul.f32 -1.442695, %v59_v27 }
  0x9a   :  { %89 = vpow2.f32 %v84_v28 }
  0xa7   :  { %v90_v29 = vpop.eup %89 }
  0xa8   :  { %v64_v30 = vadd.f32 1.0, %v90_v29 }
  0xaa   :  { %91 = vrcp.f32 %v64_v30 }
  0xb7   :  { %v92_v32 = vpop.eup %91 }
  0xb8   :  { %v68_v33 = vadd.f32 %v92_v32, %v67_v31 }
  0xba   :  { %69 = vst [vmem:[#allocation4] sm:$0x1] %v68_v33 }
  0xbb   :  { %104 = shalt.err (!%p101_p4)
}
  0xbc   :  { %79 = dma.vmem_to_hbm [thread:$0]  %s77_s8, 16, %s179_s4, [#allocation5]  }
  0xbd   :  { %113 = dma.done.wait [#allocation5], 16  }
  0xbe   :  { %114 = vsyncadd [#allocation5], 4294967280 }
  0xbf   :  { %83 = vsyncpa [#allocation5], 1 }

</bundles_post_ra>
